<compile_context>
chip_gen: v6e
topology: v6e:2x2x1
jax: 0.10.0
libtpu: 0.0.40
codegen_flags: <defaults>
</compile_context>

<pallas_src>
import functools
import math

import jax
import jax.numpy as jnp
from jax.experimental import pallas as pl
from jax.experimental.pallas import tpu as pltpu


def _label_smoothing_kernel(x_ref, tgt_ref, xt_ref, out_ref,
                            m_ref, l_ref, sx_ref, *,
                            smoothing_value, conf_minus_smooth, const_plogp,
                            ignore_index):
    k = pl.program_id(1)

    @pl.when(k == 0)
    def _init():
        m_ref[...] = jnp.full(m_ref.shape, -jnp.inf, jnp.float32)
        l_ref[...] = jnp.zeros(l_ref.shape, jnp.float32)
        sx_ref[...] = jnp.zeros(sx_ref.shape, jnp.float32)

    x = x_ref[...].astype(jnp.float32)            # (tb, tv) logits tile

    # --- online log-sum-exp over the vocab (lane) axis ---
    m_prev = m_ref[...]
    m_new = jnp.maximum(m_prev, jnp.max(x, axis=-1, keepdims=True))
    l_ref[...] = (l_ref[...] * jnp.exp(m_prev - m_new)
                  + jnp.sum(jnp.exp(x - m_new), axis=-1, keepdims=True))
    m_ref[...] = m_new

    # --- running sum of logits (only remaining extra reduction) ---
    sx_ref[...] = sx_ref[...] + jnp.sum(x, axis=-1, keepdims=True)

    @pl.when(k == pl.num_programs(1) - 1)
    def _finalize():
        tgt = tgt_ref[...]                                   # (tb, 1) int32
        lse = m_ref[...] + jnp.log(l_ref[...])               # (tb, 1)
        # wsum_i = sum_j p_ij * x_ij ;  sum_j p_ij == 1, so the V*lse term
        # of the un-fused form cancels and loss_i = C + lse_i - wsum_i.
        wsum = (jnp.float32(smoothing_value) * sx_ref[...]
                + jnp.float32(conf_minus_smooth) * xt_ref[...])
        row_loss = jnp.float32(const_plogp) + lse - wsum
        valid = (tgt != ignore_index).astype(jnp.float32)
        out_ref[...] = row_loss * valid


def _round_up(x, m):
    return ((x + m - 1) // m) * m


def _pick_vocab_tile(V, max_tv=8192):
    # Whole vocab if small (or not 128-aligned), else largest 128-multiple
    # divisor of V that fits the per-tile budget.
    if V <= max_tv or V % 128 != 0:
        return V
    t = max_tv - (max_tv % 128)
    while t >= 128:
        if V % t == 0:
            return t
        t -= 128
    return V


def _sublane(itemsize):
    return 8 if itemsize >= 4 else (16 if itemsize == 2 else 32)


def _pick_batch_tile(B, tv, in_itemsize, budget_bytes=4 * 1024 * 1024,
                     min_batch_tiles=2):
    # Respect sublane packing of the input dtype; target a multi-MiB f32
    # working set per tile (>=85% of HBM roofline per measured data) while
    # staying safe inside v7x's 64 MiB VMEM.
    sub = _sublane(in_itemsize)
    rows_budget = max(sub, budget_bytes // max(1, tv * 4))
    tb = min(1024, rows_budget)
    # Guarantee >= min_batch_tiles batch tiles when B allows, so the
    # ("parallel", ...) batch axis can shard across TensorCores on v7x.
    if B > sub:
        tb = min(tb, _round_up(pl.cdiv(B, min_batch_tiles), sub))
    tb = max(sub, (tb // sub) * sub)
    return tb


def label_smoothing_loss(output, target, *, label_smoothing, tgt_vocab_size,
                         ignore_index=-100, tb=None, tv=None):
    """output: (B, V) float logits (f32 or bf16); target: (B,) int.
    Returns scalar f32 loss (sum-reduced KL divergence)."""
    B, V = output.shape
    assert V == tgt_vocab_size
    assert 0.0 < label_smoothing <= 1.0

    smoothing_value = float(label_smoothing) / (tgt_vocab_size - 1)
    confidence = 1.0 - float(label_smoothing)
    c_logc = confidence * math.log(confidence) if confidence > 0.0 else 0.0
    const_plogp = c_logc + (V - 1) * smoothing_value * math.log(smoothing_value)

    if tv is None:
        tv = _pick_vocab_tile(V)
    assert V % tv == 0 and (tv == V or tv % 128 == 0)
    sub = _sublane(output.dtype.itemsize)
    if tb is None:
        tb = _pick_batch_tile(B, tv, output.dtype.itemsize)
    assert tb % sub == 0

    # Target logits gathered once in the wrapper (B elements of HBM traffic);
    # negative (ignored) indices are clamped — their rows are masked anyway.
    target_i32 = target.astype(jnp.int32)
    safe_idx = jnp.clip(target_i32, 0, V - 1)[:, None]
    x_tgt = jnp.take_along_axis(output, safe_idx, axis=1).astype(jnp.float32)
    target2d = target_i32.reshape(B, 1)

    # Pad batch so it divides the tile; padded rows use ignore_index and
    # therefore contribute exactly 0.
    B_pad = _round_up(B, tb)
    if B_pad != B:
        output = jnp.pad(output, ((0, B_pad - B), (0, 0)))
        target2d = jnp.pad(target2d, ((0, B_pad - B), (0, 0)),
                           constant_values=ignore_index)
        x_tgt = jnp.pad(x_tgt, ((0, B_pad - B), (0, 0)))

    kernel = functools.partial(
        _label_smoothing_kernel,
        smoothing_value=smoothing_value,
        conf_minus_smooth=confidence - smoothing_value,
        const_plogp=const_plogp,
        ignore_index=ignore_index,
    )

    grid = (B_pad // tb, V // tv)   # batch (parallel) x vocab (reduction, last)

    # VMEM budget derived from actual tile bytes (double-buffered input,
    # in-kernel f32 copies/temps, scratch) + headroom; clamped for portability.
    in_tile = tb * tv * output.dtype.itemsize
    f32_tile = tb * tv * 4
    vmem_limit = int(min(96 << 20, max(32 << 20,
                                       2 * in_tile + 6 * f32_tile + (4 << 20))))

    cost = pl.CostEstimate(
        flops=4 * B_pad * V,
        transcendentals=B_pad * V,
        bytes_accessed=B_pad * V * output.dtype.itemsize + 3 * B_pad * 4,
    )

    per_row = pl.pallas_call(
        kernel,
        out_shape=jax.ShapeDtypeStruct((B_pad, 1), jnp.float32),
        grid_spec=pltpu.PrefetchScalarGridSpec(
            num_scalar_prefetch=0,
            grid=grid,
            in_specs=[
                pl.BlockSpec((tb, tv), lambda i, k: (i, k)),   # logits
                pl.BlockSpec((tb, 1), lambda i, k: (i, 0)),    # targets
                pl.BlockSpec((tb, 1), lambda i, k: (i, 0)),    # gathered x[tgt]
            ],
            out_specs=pl.BlockSpec((tb, 1), lambda i, k: (i, 0)),
            scratch_shapes=[
                pltpu.VMEM((tb, 1), jnp.float32),  # running max
                pltpu.VMEM((tb, 1), jnp.float32),  # running sum of exp
                pltpu.VMEM((tb, 1), jnp.float32),  # running sum of logits
            ],
        ),
        compiler_params=pltpu.CompilerParams(
            dimension_semantics=("parallel", "arbitrary"),
            vmem_limit_bytes=vmem_limit,
        ),
        cost_estimate=cost,
    )(output, target2d, x_tgt)

    # Tiny final reduction over per-row (already validity-masked) losses.
    return jnp.sum(per_row)


def _reference_loss(output, target, *, label_smoothing, tgt_vocab_size,
                    ignore_index):
    # Pure-JAX reference (masked-sum form == PyTorch's filtered-rows form).
    B, V = output.shape
    smoothing_value = label_smoothing / (tgt_vocab_size - 1)
    confidence = 1.0 - label_smoothing
    logp = jax.nn.log_softmax(output.astype(jnp.float32), axis=-1)
    onehot = jax.nn.one_hot(jnp.clip(target, 0, V - 1), V, dtype=jnp.float32)
    p = onehot * confidence + (1.0 - onehot) * smoothing_value
    plogp = jnp.where(p > 0, p * jnp.log(jnp.where(p > 0, p, 1.0)), 0.0)
    kl = plogp - p * logp
    valid = (target != ignore_index).astype(jnp.float32)[:, None]
    return jnp.sum(kl * valid)


if __name__ == "__main__":
    key = jax.random.PRNGKey(0)

    # --- test 1: small module-like shapes, auto-picked tiles ---
    B, V = 32, 256
    label_smoothing = 0.1
    ignore_index = -1   # module docstring: `-1` is ignored
    k1, k2, k3, k4, k5, k6, k7, k8, k9 = jax.random.split(key, 9)
    output = jax.random.normal(k1, (B, V), dtype=jnp.float32)
    target = jax.random.randint(k2, (B,), 0, V, dtype=jnp.int32)
    target = jnp.where(jax.random.bernoulli(k3, 0.25, (B,)),
                       jnp.int32(ignore_index), target)

    loss = label_smoothing_loss(output, target,
                                label_smoothing=label_smoothing,
                                tgt_vocab_size=V,
                                ignore_index=ignore_index)
    loss = jax.block_until_ready(loss)
    ref = _reference_loss(output, target,
                          label_smoothing=label_smoothing,
                          tgt_vocab_size=V, ignore_index=ignore_index)
    assert jnp.allclose(loss, ref, rtol=2e-4, atol=1e-2), (loss, ref)

    # --- test 2: batch padding, multi batch-tiles and vocab tiling
    #             (online log-sum-exp path) ---
    B2, V2 = 20, 512
    ls2, ii2 = 0.2, -100
    out2 = jax.random.normal(k4, (B2, V2), dtype=jnp.float32)
    tgt2 = jax.random.randint(k5, (B2,), 0, V2, dtype=jnp.int32)
    tgt2 = jnp.where(jax.random.bernoulli(k6, 0.3, (B2,)),
                     jnp.int32(ii2), tgt2)
    loss2 = label_smoothing_loss(out2, tgt2, label_smoothing=ls2,
                                 tgt_vocab_size=V2, ignore_index=ii2,
                                 tb=16, tv=128)
    loss2 = jax.block_until_ready(loss2)
    ref2 = _reference_loss(out2, tgt2, label_smoothing=ls2,
                           tgt_vocab_size=V2, ignore_index=ii2)
    assert jnp.allclose(loss2, ref2, rtol=2e-4, atol=1e-2), (loss2, ref2)

    # --- test 3: bf16 logits end-to-end (no wrapper upcast), vocab tiling ---
    B3, V3 = 24, 384
    ls3, ii3 = 1.0, -1   # also exercises the confidence==0 edge case
    out3 = jax.random.normal(k7, (B3, V3), dtype=jnp.bfloat16)
    tgt3 = jax.random.randint(k8, (B3,), 0, V3, dtype=jnp.int32)
    tgt3 = jnp.where(jax.random.bernoulli(k9, 0.2, (B3,)),
                     jnp.int32(ii3), tgt3)
    loss3 = label_smoothing_loss(out3, tgt3, label_smoothing=ls3,
                                 tgt_vocab_size=V3, ignore_index=ii3,
                                 tb=16, tv=128)
    loss3 = jax.block_until_ready(loss3)
    ref3 = _reference_loss(out3, tgt3, label_smoothing=ls3,
                           tgt_vocab_size=V3, ignore_index=ii3)
    assert jnp.allclose(loss3, ref3, rtol=5e-3, atol=5e-2), (loss3, ref3)

    print("KERNEL_OK")
</pallas_src>

<mosaic_0001>
module attributes {stable_mosaic.version = 11 : i64} {
  func.func @_label_smoothing_kernel(%arg0: i32, %arg1: i32, %arg2: memref<16x256xf32, #tpu.memory_space<vmem>>, %arg3: memref<16x1xi32, #tpu.memory_space<vmem>>, %arg4: memref<16x1xf32, #tpu.memory_space<vmem>>, %arg5: memref<16x1xf32, #tpu.memory_space<vmem>>, %arg6: memref<16x1xf32, #tpu.memory_space<vmem>>, %arg7: memref<16x1xf32, #tpu.memory_space<vmem>>, %arg8: memref<16x1xf32, #tpu.memory_space<vmem>>) attributes {dimension_semantics = [#tpu.dimension_semantics<parallel>, #tpu.dimension_semantics<arbitrary>], iteration_bounds = array<i64: 2, 1>, scalar_prefetch = 0 : i64, scratch_operands = 3 : i64, tpu.core_type = #tpu.core_type<tc>, window_params = [{transform_indices = @transform_0, window_bounds = array<i64: 16, 256>}, {transform_indices = @transform_1, window_bounds = array<i64: 16, 1>}, {transform_indices = @transform_2, window_bounds = array<i64: 16, 1>}, {transform_indices = @transform_3, window_bounds = array<i64: 16, 1>}]} {
    %c0_i32 = arith.constant 0 : i32
    %0 = arith.cmpi eq, %arg1, %c0_i32 : i32
    %1 = arith.extui %0 : i1 to i32
    %c0_i32_0 = arith.constant 0 : i32
    %2 = arith.cmpi ne, %1, %c0_i32_0 : i32
    scf.if %2 {
      %cst_18 = arith.constant 0xFF800000 : f32
      %28 = vector.broadcast %cst_18 : f32 to vector<16x1xf32>
      %c0_19 = arith.constant 0 : index
      %c0_20 = arith.constant 0 : index
      %29 = vector.load %arg6[%c0_19, %c0_20] : memref<16x1xf32, #tpu.memory_space<vmem>>, vector<16x1xf32>
      tpu.vector_store %arg6[%c0_19, %c0_20], %28 {strides = array<i32>} : memref<16x1xf32, #tpu.memory_space<vmem>>, vector<16x1xf32>,
      %cst_21 = arith.constant 0.000000e+00 : f32
      %30 = vector.broadcast %cst_21 : f32 to vector<16x1xf32>
      %c0_22 = arith.constant 0 : index
      %c0_23 = arith.constant 0 : index
      %31 = vector.load %arg7[%c0_22, %c0_23] : memref<16x1xf32, #tpu.memory_space<vmem>>, vector<16x1xf32>
      tpu.vector_store %arg7[%c0_22, %c0_23], %30 {strides = array<i32>} : memref<16x1xf32, #tpu.memory_space<vmem>>, vector<16x1xf32>,
      %cst_24 = arith.constant 0.000000e+00 : f32
      %32 = vector.broadcast %cst_24 : f32 to vector<16x1xf32>
      %c0_25 = arith.constant 0 : index
      %c0_26 = arith.constant 0 : index
      %33 = vector.load %arg8[%c0_25, %c0_26] : memref<16x1xf32, #tpu.memory_space<vmem>>, vector<16x1xf32>
      tpu.vector_store %arg8[%c0_25, %c0_26], %32 {strides = array<i32>} : memref<16x1xf32, #tpu.memory_space<vmem>>, vector<16x1xf32>,
    } else {
    }
    %c0 = arith.constant 0 : index
    %c0_1 = arith.constant 0 : index
    %3 = vector.load %arg2[%c0, %c0_1] : memref<16x256xf32, #tpu.memory_space<vmem>>, vector<16x256xf32>
    %c0_2 = arith.constant 0 : index
    %c0_3 = arith.constant 0 : index
    %4 = vector.load %arg6[%c0_2, %c0_3] : memref<16x1xf32, #tpu.memory_space<vmem>>, vector<16x1xf32>
    %cst = arith.constant dense<0xFF800000> : vector<16xf32>
    %5 = vector.multi_reduction <maximumf>, %3, %cst [1] : vector<16x256xf32> to vector<16xf32>
    %6 = vector.shape_cast %5 : vector<16xf32> to vector<16x1xf32>
    %7 = arith.maximumf %4, %6 : vector<16x1xf32>
    %c0_4 = arith.constant 0 : index
    %c0_5 = arith.constant 0 : index
    %8 = vector.load %arg7[%c0_4, %c0_5] : memref<16x1xf32, #tpu.memory_space<vmem>>, vector<16x1xf32>
    %9 = arith.subf %4, %7 : vector<16x1xf32>
    %10 = math.exp %9 : vector<16x1xf32>
    %11 = arith.mulf %8, %10 : vector<16x1xf32>
    %12 = vector.broadcast %7 : vector<16x1xf32> to vector<16x256xf32>
    %13 = arith.subf %3, %12 : vector<16x256xf32>
    %14 = math.exp %13 : vector<16x256xf32>
    %cst_6 = arith.constant dense<0.000000e+00> : vector<16xf32>
    %15 = vector.multi_reduction <add>, %14, %cst_6 [1] : vector<16x256xf32> to vector<16xf32>
    %16 = vector.shape_cast %15 : vector<16xf32> to vector<16x1xf32>
    %17 = arith.addf %11, %16 : vector<16x1xf32>
    %c0_7 = arith.constant 0 : index
    %c0_8 = arith.constant 0 : index
    %18 = vector.load %arg7[%c0_7, %c0_8] : memref<16x1xf32, #tpu.memory_space<vmem>>, vector<16x1xf32>
    tpu.vector_store %arg7[%c0_7, %c0_8], %17 {strides = array<i32>} : memref<16x1xf32, #tpu.memory_space<vmem>>, vector<16x1xf32>,
    %c0_9 = arith.constant 0 : index
    %c0_10 = arith.constant 0 : index
    %19 = vector.load %arg6[%c0_9, %c0_10] : memref<16x1xf32, #tpu.memory_space<vmem>>, vector<16x1xf32>
    tpu.vector_store %arg6[%c0_9, %c0_10], %7 {strides = array<i32>} : memref<16x1xf32, #tpu.memory_space<vmem>>, vector<16x1xf32>,
    %c0_11 = arith.constant 0 : index
    %c0_12 = arith.constant 0 : index
    %20 = vector.load %arg8[%c0_11, %c0_12] : memref<16x1xf32, #tpu.memory_space<vmem>>, vector<16x1xf32>
    %cst_13 = arith.constant dense<0.000000e+00> : vector<16xf32>
    %21 = vector.multi_reduction <add>, %3, %cst_13 [1] : vector<16x256xf32> to vector<16xf32>
    %22 = vector.shape_cast %21 : vector<16xf32> to vector<16x1xf32>
    %23 = arith.addf %20, %22 : vector<16x1xf32>
    %c0_14 = arith.constant 0 : index
    %c0_15 = arith.constant 0 : index
    %24 = vector.load %arg8[%c0_14, %c0_15] : memref<16x1xf32, #tpu.memory_space<vmem>>, vector<16x1xf32>
    tpu.vector_store %arg8[%c0_14, %c0_15], %23 {strides = array<i32>} : memref<16x1xf32, #tpu.memory_space<vmem>>, vector<16x1xf32>,
    %c0_i32_16 = arith.constant 0 : i32
    %25 = arith.cmpi eq, %arg1, %c0_i32_16 : i32
    %26 = arith.extui %25 : i1 to i32
    %c0_i32_17 = arith.constant 0 : i32
    %27 = arith.cmpi ne, %26, %c0_i32_17 : i32
    scf.if %27 {
      %c0_18 = arith.constant 0 : index
      %c0_19 = arith.constant 0 : index
      %28 = vector.load %arg3[%c0_18, %c0_19] : memref<16x1xi32, #tpu.memory_space<vmem>>, vector<16x1xi32>
      %c0_20 = arith.constant 0 : index
      %c0_21 = arith.constant 0 : index
      %29 = vector.load %arg6[%c0_20, %c0_21] : memref<16x1xf32, #tpu.memory_space<vmem>>, vector<16x1xf32>
      %c0_22 = arith.constant 0 : index
      %c0_23 = arith.constant 0 : index
      %30 = vector.load %arg7[%c0_22, %c0_23] : memref<16x1xf32, #tpu.memory_space<vmem>>, vector<16x1xf32>
      %31 = math.log %30 : vector<16x1xf32>
      %32 = arith.addf %29, %31 : vector<16x1xf32>
      %c0_24 = arith.constant 0 : index
      %c0_25 = arith.constant 0 : index
      %33 = vector.load %arg8[%c0_24, %c0_25] : memref<16x1xf32, #tpu.memory_space<vmem>>, vector<16x1xf32>
      %cst_26 = arith.constant 3.92156857E-4 : f32
      %34 = vector.broadcast %cst_26 : f32 to vector<16x1xf32>
      %35 = arith.mulf %34, %33 : vector<16x1xf32>
      %c0_27 = arith.constant 0 : index
      %c0_28 = arith.constant 0 : index
      %36 = vector.load %arg4[%c0_27, %c0_28] : memref<16x1xf32, #tpu.memory_space<vmem>>, vector<16x1xf32>
      %cst_29 = arith.constant 0.899607837 : f32
      %37 = vector.broadcast %cst_29 : f32 to vector<16x1xf32>
      %38 = arith.mulf %37, %36 : vector<16x1xf32>
      %39 = arith.addf %35, %38 : vector<16x1xf32>
      %cst_30 = arith.constant -0.879209339 : f32
      %40 = vector.broadcast %cst_30 : f32 to vector<16x1xf32>
      %41 = arith.addf %40, %32 : vector<16x1xf32>
      %42 = arith.subf %41, %39 : vector<16x1xf32>
      %c-1_i32 = arith.constant -1 : i32
      %43 = vector.broadcast %c-1_i32 : i32 to vector<16x1xi32>
      %44 = arith.cmpi ne, %28, %43 : vector<16x1xi32>
      %45 = arith.extui %44 : vector<16x1xi1> to vector<16x1xi32>
      %46 = arith.sitofp %45 : vector<16x1xi32> to vector<16x1xf32>
      %47 = arith.mulf %42, %46 : vector<16x1xf32>
      %c0_31 = arith.constant 0 : index
      %c0_32 = arith.constant 0 : index
      %48 = vector.load %arg5[%c0_31, %c0_32] : memref<16x1xf32, #tpu.memory_space<vmem>>, vector<16x1xf32>
      tpu.vector_store %arg5[%c0_31, %c0_32], %47 {strides = array<i32>} : memref<16x1xf32, #tpu.memory_space<vmem>>, vector<16x1xf32>,
    } else {
    }
    return
  }
  func.func @transform_0(%arg0: i32, %arg1: i32) -> (i32, i32) {
    %c0_i32 = arith.constant 0 : i32
    return %arg0, %arg1 : i32, i32
  }
  func.func @transform_1(%arg0: i32, %arg1: i32) -> (i32, i32) {
    %c0_i32 = arith.constant 0 : i32
    %c0_i32_0 = arith.constant 0 : i32
    return %arg0, %c0_i32 : i32, i32
  }
  func.func @transform_2(%arg0: i32, %arg1: i32) -> (i32, i32) {
    %c0_i32 = arith.constant 0 : i32
    %c0_i32_0 = arith.constant 0 : i32
    return %arg0, %c0_i32 : i32, i32
  }
  func.func @transform_3(%arg0: i32, %arg1: i32) -> (i32, i32) {
    %c0_i32 = arith.constant 0 : i32
    %c0_i32_0 = arith.constant 0 : i32
    return %arg0, %c0_i32 : i32, i32
  }
}

</mosaic_0001>

<bundles_post_ra>
// kernel: tpu_custom_call.1
= control target key start
LH: loop header
LB: loop body
LE: loop exit
PB: predicated region body
PF: predicated region fallthrough
CT: control target
= control target key end

     0   :  { %s576_s12 = smov 0   ;;  %s578_s13 = smov 0   ;;  %s640_s0 = inlined_call_operand.vmem [shape: f32[32,256], index: 0, kind: input, shape index: {}]   ;;  %s641_s1 = inlined_call_operand.vmem [shape: s32[32,1], index: 1, kind: input, shape index: {}]   ;;  %s642_s2 = inlined_call_operand.vmem [shape: f32[32,1], index: 2, kind: input, shape index: {}]   ;;  %s643_s3 = inlined_call_operand.vmem [shape: f32[32,1], index: 3, kind: output, shape index: {}]  }
   0x1   :  { %s580_s14 = smov 0  }
   0x2 LB: > { %s25_s15 = sadd.s32 1, %s547_s13  ;;  %p469_p0 = scmp.ge.s32.totalorder %s551_s14, 1  ;;  %s551_s14 = sphi %s580_s14, %s13_s14   ;;  %s547_s13 = sphi %s578_s13, %s645_s13   ;;  %s543_s12 = sphi %s576_s12, %s644_s12  }
   0x3   : > { %p27_p1 = scmp.ge.s32.totalorder %s25_s15, 2  ;;  %p180_p2 = scmp.lt.s32.totalorder %s551_s14, 3 }
   0x5   : > { %s647_s15 = smov (%p27_p1, %s25_s15), 0  ;;  %p181_p3 = pnand %p469_p0, %p180_p2 }
   0x6   : > { %s470_s16 = sshll.u32 (!%p181_p3), %s543_s12, 1 }
   0x7   : > { %184 = sbr.rel (%p181_p3) target bundleno = 480 (0x1e0), region = 32  ;;  %p221_p4 = scmp.lt.s32.totalorder (!%p181_p3), %s470_s16, 3 }
   0xc   : > { %vm253_vm0 = vcmask 7168   ;;  %v553_v0 = vmov -inf   ;;  %v554_v1 = vmov 0.0   ;;  %s649_s16 = smov (!%p221_p4, %s470_s16), 3  ;;  %v555_v12 = vmov 0  }
   0xd   : > { %254 = vst.msk [vmem:[#allocation2] sm:$0xff] %vm253_vm0, %v553_v0  ;;  %255 = vst.msk [vmem:[#allocation2 + $0x8] sm:$0xff] %vm253_vm0, %v553_v0  ;;  %s483_s17 = sshll.u32 %s649_s16, 4  ;;  %s600_s18 = sshll.u32 %s649_s16, 3  ;;  %511 = vset.pattern.permute.xlu1 %v555_v12  ;;  %512 = vset.pattern.permute.xlu0 %v555_v12 }
   0xe   : > { %256 = vst.msk [vmem:[#allocation3] sm:$0xff] %vm253_vm0, %v554_v1  ;;  %257 = vst.msk [vmem:[#allocation3 + $0x8] sm:$0xff] %vm253_vm0, %v554_v1  ;;  %s228_s21 = scalar_lea.vmem %s640_s0, %s483_s17  ;;  %s235_s24 = scalar_lea.vmem %s641_s1, %s600_s18 }
   0xf   : > { %258 = vst.msk [vmem:[#allocation4] sm:$0xff] %vm253_vm0, %v554_v1  ;;  %259 = vst.msk [vmem:[#allocation4 + $0x8] sm:$0xff] %vm253_vm0, %v554_v1  ;;  %v260_v2 = vld [vmem:[%s228_s21] sm:$0xff]  ;;  %v261_v3 = vld [vmem:[%s228_s21 + $0x8] sm:$0xff]  ;;  %s241_s27 = scalar_lea.vmem %s642_s2, %s600_s18  ;;  %s247_s30 = scalar_lea.vmem %s643_s3, %s600_s18 }
  0x10   : > { %v334_v4 = vld [vmem:[%s235_s24] sm:$0xff]  ;;  %v266_v5 = vmax.f32 %v260_v2, %v261_v3  ;;  %v335_v6 = vld [vmem:[%s235_s24 + $0x8] sm:$0xff]  ;;  %v262_v9 = vld [vmem:[%s228_s21 + $0x10] sm:$0xff]  ;;  %v321_v35 = vadd.f32 %v261_v3, %v260_v2 }
  0x11   : > { %vm360_vm1 = vcmp.ne.s32.totalorder %v334_v4, 4294967295  ;;  %vm361_vm2 = vcmp.ne.s32.totalorder %v335_v6, 4294967295  ;;  %v263_v10 = vld [vmem:[%s228_s21 + $0x18] sm:$0xff]  ;;  %v350_v59 = vld [vmem:[%s241_s27] sm:$0xff]  ;;  %v351_v0 = vld [vmem:[%s241_s27 + $0x8] sm:$0xff] }
  0x12   : > { %v609_v7 = vsel %vm360_vm1, 1.0, %v554_v1  ;;  %v611_v8 = vsel %vm361_vm2, 1.0, %v554_v1  ;;  %267 = vmax.xlane.f32.xlu0 %v266_v5  ;;  %v269_v11 = vmax.f32 %v262_v9, %v263_v10  ;;  %v324_v38 = vadd.f32 %v263_v10, %v262_v9 }
  0x13   : > { %v352_v61 = vmul.f32 0.89960784, %v350_v59  ;;  %v353_v4 = vmul.f32 0.89960784, %v351_v0 }
  0x14   : > { %v264_v13 = vld [vmem:[#allocation2] sm:$0xff]  ;;  %v265_v16 = vld [vmem:[#allocation2 + $0x8] sm:$0xff] }
  0x15   : > { %v274_v42 = vld [vmem:[#allocation3] sm:$0xff]  ;;  %v275_v46 = vld [vmem:[#allocation3 + $0x8] sm:$0xff] }
  0x16   : > { %270 = vmax.xlane.f32.xlu0 %v269_v11  ;;  %v319_v48 = vld [vmem:[#allocation4] sm:$0xff]  ;;  %v320_v54 = vld [vmem:[#allocation4 + $0x8] sm:$0xff] }
  0x9b   : > { %v268_v14 = vpop.xlane.xlu0 %267 }
  0x9c   : > { %v272_v15 = vmax.f32 %v264_v13, %v268_v14 }
  0x9e   : > { %v276_v17 = vsub.f32 %v264_v13, %v272_v15  ;;  %317 = vst.msk [vmem:[#allocation2] sm:$0xff] %vm253_vm0, %v272_v15  ;;  %286 = vperm.xlu1 %511, %v272_v15  }
  0x9f   : > { %v271_v18 = vpop.xlane.xlu0 %270 }
  0xa0   : > { %v273_v19 = vmax.f32 %v265_v16, %v271_v18  ;;  %v278_v39 = vmul.f32 1.442695, %v276_v17 }
  0xa2   : > { %v277_v20 = vsub.f32 %v265_v16, %v273_v19  ;;  %318 = vst.msk [vmem:[#allocation2 + $0x8] sm:$0xff] %vm253_vm0, %v273_v19  ;;  %291 = vperm.xlu1 %511, %v273_v19  }
  0xa4   : > { %v280_v40 = vmul.f32 1.442695, %v277_v20 }
  0xa9   : > { %v337_v13 = vld [vmem:[#allocation2 + $0x8] sm:$0xff] }
 0x119   : > { %v287_v21 = vpop.permute.xlu1 %286 }
 0x11a   : > { %v294_v22 = vsub.f32 %v260_v2, %v287_v21  ;;  %v295_v23 = vsub.f32 %v261_v3, %v287_v21  ;;  %v336_v3 = vld [vmem:[#allocation2] sm:$0xff] }
 0x11c   : > { %v298_v24 = vmul.f32 1.442695, %v294_v22  ;;  %v300_v25 = vmul.f32 1.442695, %v295_v23 }
 0x11d   : > { %v292_v26 = vpop.permute.xlu1 %291 }
 0x11e   : > { %513 = vpow2.f32 %v298_v24  ;;  %v296_v27 = vsub.f32 %v262_v9, %v292_v26  ;;  %v297_v28 = vsub.f32 %v263_v10, %v292_v26 }
 0x11f   : > { %515 = vpow2.f32 %v300_v25 }
 0x120   : > { %v302_v29 = vmul.f32 1.442695, %v296_v27  ;;  %v304_v30 = vmul.f32 1.442695, %v297_v28 }
 0x122   : > { %517 = vpow2.f32 %v302_v29 }
 0x123   : > { %519 = vpow2.f32 %v304_v30 }
 0x124   : > { %521 = vpow2.f32 %v278_v39 }
 0x125   : > { %523 = vpow2.f32 %v280_v40 }
 0x12b   : > { %v514_v31 = vpop.eup %513 }
 0x12c   : > { %v516_v32 = vpop.eup %515 }
 0x12d   : > { %v306_v33 = vadd.f32 %v516_v32, %v514_v31 }
 0x12f   : > { %v518_v34 = vpop.eup %517  ;;  %307 = vadd.xlane.f32.xlu0 %v306_v33 }
 0x130   : > { %v520_v36 = vpop.eup %519 }
 0x131   : > { %v309_v37 = vadd.f32 %v520_v36, %v518_v34  ;;  %v522_v41 = vpop.eup %521 }
 0x132   : > { %v282_v43 = vmul.f32 %v522_v41, %v274_v42  ;;  %v524_v44 = vpop.eup %523 }
 0x133   : > { %310 = vadd.xlane.f32.xlu1 %v309_v37  ;;  %322 = vadd.xlane.f32.xlu0 %v321_v35  ;;  %v283_v49 = vmul.f32 %v524_v44, %v275_v46 }
 0x137   : > { %325 = vadd.xlane.f32.xlu0 %v324_v38 }
 0x1b8   : > { %v308_v45 = vpop.xlane.xlu0 %307 }
 0x1b9   : > { %v312_v47 = vadd.f32 %v308_v45, %v282_v43 }
 0x1bb   : > { %315 = vst.msk [vmem:[#allocation3] sm:$0xff] %vm253_vm0, %v312_v47 }
 0x1bc   : > { %v311_v50 = vpop.xlane.xlu1 %310  ;;  %v323_v51 = vpop.xlane.xlu0 %322 }
 0x1bd   : > { %v313_v52 = vadd.f32 %v311_v50, %v283_v49  ;;  %v327_v53 = vadd.f32 %v323_v51, %v319_v48 }
 0x1bf   : > { %316 = vst.msk [vmem:[#allocation3 + $0x8] sm:$0xff] %vm253_vm0, %v313_v52  ;;  %329 = vst.msk [vmem:[#allocation4] sm:$0xff] %vm253_vm0, %v327_v53 }
 0x1c0   : > { %v326_v55 = vpop.xlane.xlu0 %325 }
 0x1c1   : > { %v328_v56 = vadd.f32 %v326_v55, %v320_v54 }
 0x1c2   : > { %v338_v57 = vld [vmem:[#allocation3] sm:$0xff] }
 0x1c3   : > { %525 = vlog2.f32 %v338_v57  ;;  %330 = vst.msk [vmem:[#allocation4 + $0x8] sm:$0xff] %vm253_vm0, %v328_v56 }
 0x1c6   : > { %v339_v58 = vld [vmem:[#allocation3 + $0x8] sm:$0xff]  ;;  %v346_v60 = vld [vmem:[#allocation4] sm:$0xff] }
 0x1c7   : > { %527 = vlog2.f32 %v339_v58  ;;  %v348_v62 = vmul.f32 0.00039215686, %v346_v60 }
 0x1c9   : > { %v354_v6 = vadd.f32 %v352_v61, %v348_v62 }
 0x1ca   : > { %v347_v1 = vld [vmem:[#allocation4 + $0x8] sm:$0xff] }
 0x1cb   : > { %v349_v9 = vmul.f32 0.00039215686, %v347_v1 }
 0x1cd   : > { %v355_v16 = vadd.f32 %v353_v4, %v349_v9 }
 0x1d0   : > { %v526_v63 = vpop.eup %525 }
 0x1d1   : > { %v341_v2 = vmul.f32 0.6931472, %v526_v63 }
 0x1d3   : > { %v344_v5 = vadd.f32 %v341_v2, %v336_v3 }
 0x1d4   : > { %v528_v10 = vpop.eup %527 }
 0x1d5   : > { %v343_v11 = vmul.f32 0.6931472, %v528_v10  ;;  %v356_v12 = vadd.f32 -0.87920934, %v344_v5 }
 0x1d7   : > { %v358_v14 = vsub.f32 %v356_v12, %v354_v6  ;;  %v345_v15 = vadd.f32 %v343_v11, %v337_v13 }
 0x1d9   : > { %v366_v17 = vmul.f32 %v609_v7, %v358_v14  ;;  %v357_v18 = vadd.f32 -0.87920934, %v345_v15 }
 0x1db   : > { %368 = vst.msk [vmem:[%s247_s30] sm:$0xff] %vm253_vm0, %v366_v17  ;;  %v359_v19 = vsub.f32 %v357_v18, %v355_v16 }
 0x1dd   : > { %v367_v20 = vmul.f32 %v611_v8, %v359_v19 }
 0x1df   : > { %369 = vst.msk [vmem:[%s247_s30 + $0x8] sm:$0xff] %vm253_vm0, %v367_v20 }
 0x1e0 PF: > { %s13_s14 = sadd.s32 1, %s551_s14   ;;  %s644_s12 = smov %s547_s13 }
 0x1e1   : > { %p10_p5 = scmp.ge.s32.totalorder %s13_s14, 4   ;;  %s645_s13 = smov %s647_s15 }
 0x1e3   :  { %12 = sbr.rel (!%p10_p5) target bundleno = 2 (0x2), region = 76 }

</bundles_post_ra>
